<compile_context>
chip_gen: v7x
topology: tpu7x:2x2x1
jax: 0.10.0
libtpu: 0.0.40
codegen_flags: <defaults>
</compile_context>

<pallas_src>
import functools

import jax
import jax.numpy as jnp
from jax.experimental import pallas as pl
from jax.experimental.pallas import tpu as pltpu

HIDDEN = 30
TILE_B = 512  # batch rows per grid step (multiple of 128)


def _round_up(x, m):
    return (x + m - 1) // m * m


def cnet_kernel(xt_ref, w1t_ref, b1t_ref, wot_ref, bo_ref, out_ref):
    # xt_ref  : (K, TILE_B)   features on sublanes, batch on lanes
    # w1t_ref : (HIDDEN, K)   [Ws ; Wa]^T
    # b1t_ref : (HIDDEN, 1)   (bs + ba)^T
    # wot_ref : (HIDDEN, 1)   final projection weights as a column
    # bo_ref  : (1, 1)        final bias
    # out_ref : (1, TILE_B)   lane-dense output row
    net = jnp.maximum(
        jnp.dot(w1t_ref[...], xt_ref[...], preferred_element_type=jnp.float32)
        + b1t_ref[...],
        0.0)                                                  # (HIDDEN, TILE_B)
    # Final 30 -> 1 projection as VPU mul + sublane reduce (no N=1 MXU pass).
    q = jnp.sum(net * wot_ref[...], axis=0, keepdims=True) + bo_ref[...]
    out_ref[...] = q.astype(out_ref.dtype)                    # (1, TILE_B)


@functools.partial(jax.jit, static_argnames=("tile_b",))
def cnet_forward(s, a, params, tile_b=TILE_B):
    """s: (B, s_dim) f32, a: (B, a_dim) f32 -> (B, 1) f32."""
    B = s.shape[0]
    K = s.shape[1] + a.shape[1]

    # Choose a batch tile: multiple of 128, no bigger than needed.
    tile = min(tile_b, _round_up(max(B, 1), 128))
    B_pad = _round_up(max(B, 1), tile)
    num_tiles = B_pad // tile

    # ---- host-side packing (tiny; fused by XLA under jit) -------------------
    x = jnp.concatenate([s, a], axis=1)                        # (B, K)
    x_t = jnp.transpose(x)                                     # (K, B)
    if B_pad != B:
        x_t = jnp.pad(x_t, ((0, 0), (0, B_pad - B)))           # (K, B_pad)

    w1t = jnp.concatenate([params["ws"], params["wa"]], axis=0).T   # (30, K)
    b1t = (params["bs"] + params["ba"]).reshape(HIDDEN, 1)          # (30, 1)
    wot = params["wo"].reshape(HIDDEN, 1)                           # (30, 1)
    bo = params["bo"].reshape(1, 1)                                 # (1, 1)

    out_row = pl.pallas_call(
        cnet_kernel,
        out_shape=jax.ShapeDtypeStruct((1, B_pad), jnp.float32),
        grid=(num_tiles,),
        in_specs=[
            pl.BlockSpec((K, tile), lambda i: (0, i)),        # activations
            pl.BlockSpec((HIDDEN, K), lambda i: (0, 0)),      # fused W1^T
            pl.BlockSpec((HIDDEN, 1), lambda i: (0, 0)),      # fused bias
            pl.BlockSpec((HIDDEN, 1), lambda i: (0, 0)),      # out weights
            pl.BlockSpec((1, 1), lambda i: (0, 0)),           # out bias
        ],
        out_specs=pl.BlockSpec((1, tile), lambda i: (0, i)),
        compiler_params=pltpu.CompilerParams(
            dimension_semantics=("parallel",),
            vmem_limit_bytes=32 * 1024 * 1024),
        cost_estimate=pl.CostEstimate(
            flops=2 * B_pad * (K + 1) * HIDDEN,
            transcendentals=0,
            bytes_accessed=(B_pad * (K + 1) + HIDDEN * (K + 2) + 1) * 4),
    )(x_t, w1t, b1t, wot, bo)

    return out_row[0, :B][:, None]                             # (B, 1)


def init_cnet_params(key, s_dim, a_dim, hidden=HIDDEN):
    """Mirrors the PyTorch __init__: weights ~ Normal(0, 0.1); biases use
    PyTorch's default Uniform(-1/sqrt(fan_in), 1/sqrt(fan_in)).
    Weights stored (in_features, out_features)."""
    k = jax.random.split(key, 6)
    ws = 0.1 * jax.random.normal(k[0], (s_dim, hidden), jnp.float32)
    wa = 0.1 * jax.random.normal(k[1], (a_dim, hidden), jnp.float32)
    wo = 0.1 * jax.random.normal(k[2], (hidden, 1), jnp.float32)
    bs = jax.random.uniform(k[3], (1, hidden), jnp.float32,
                            -1.0 / jnp.sqrt(s_dim), 1.0 / jnp.sqrt(s_dim))
    ba = jax.random.uniform(k[4], (1, hidden), jnp.float32,
                            -1.0 / jnp.sqrt(a_dim), 1.0 / jnp.sqrt(a_dim))
    bo = jax.random.uniform(k[5], (1, 1), jnp.float32,
                            -1.0 / jnp.sqrt(hidden), 1.0 / jnp.sqrt(hidden))
    return {"ws": ws, "bs": bs, "wa": wa, "ba": ba, "wo": wo, "bo": bo}


def cnet_reference(s, a, p):
    x = s @ p["ws"] + p["bs"]
    y = a @ p["wa"] + p["ba"]
    net = jnp.maximum(x + y, 0.0)
    return net @ p["wo"] + p["bo"]


if __name__ == "__main__":
    # Small shapes consistent with a gym env: batch=2, s_dim=4, a_dim=2.
    B, S_DIM, A_DIM = 2, 4, 2
    key = jax.random.PRNGKey(0)
    k_s, k_a, k_p = jax.random.split(key, 3)

    s = jax.random.normal(k_s, (B, S_DIM), jnp.float32)
    a = jax.random.normal(k_a, (B, A_DIM), jnp.float32)
    params = init_cnet_params(k_p, S_DIM, A_DIM)

    out = jax.block_until_ready(cnet_forward(s, a, params))
    ref = cnet_reference(s, a, params)
    assert out.shape == (B, 1), out.shape
    assert jnp.allclose(out, ref, atol=1e-4, rtol=1e-4), (out, ref)

    # Also exercise the multi-tile grid path with a training-sized batch.
    B2 = 1000
    k_s2, k_a2 = jax.random.split(jax.random.PRNGKey(1), 2)
    s2 = jax.random.normal(k_s2, (B2, S_DIM), jnp.float32)
    a2 = jax.random.normal(k_a2, (B2, A_DIM), jnp.float32)
    out2 = jax.block_until_ready(cnet_forward(s2, a2, params))
    ref2 = cnet_reference(s2, a2, params)
    assert out2.shape == (B2, 1), out2.shape
    assert jnp.allclose(out2, ref2, atol=1e-4, rtol=1e-4), \
        float(jnp.max(jnp.abs(out2 - ref2)))

    print("KERNEL_OK")
</pallas_src>

<mosaic_0001>
module attributes {stable_mosaic.version = 11 : i64} {
  func.func @cnet_kernel(%arg0: i32, %arg1: memref<6x128xf32, #tpu.memory_space<vmem>>, %arg2: memref<30x6xf32, #tpu.memory_space<vmem>>, %arg3: memref<30x1xf32, #tpu.memory_space<vmem>>, %arg4: memref<30x1xf32, #tpu.memory_space<vmem>>, %arg5: memref<1x1xf32, #tpu.memory_space<vmem>>, %arg6: memref<1x128xf32, #tpu.memory_space<vmem>>) attributes {dimension_semantics = [#tpu.dimension_semantics<parallel>], iteration_bounds = array<i64: 1>, scalar_prefetch = 0 : i64, scratch_operands = 0 : i64, tpu.core_type = #tpu.core_type<tc>, window_params = [{transform_indices = @transform_0, window_bounds = array<i64: 6, 128>}, {pipeline_mode = #tpu.pipeline_mode<synchronous>, transform_indices = @transform_1, window_bounds = array<i64: 30, 6>}, {pipeline_mode = #tpu.pipeline_mode<synchronous>, transform_indices = @transform_2, window_bounds = array<i64: 30, 1>}, {pipeline_mode = #tpu.pipeline_mode<synchronous>, transform_indices = @transform_3, window_bounds = array<i64: 30, 1>}, {pipeline_mode = #tpu.pipeline_mode<synchronous>, transform_indices = @transform_4, window_bounds = array<i64: 1, 1>}, {transform_indices = @transform_5, window_bounds = array<i64: 1, 128>}]} {
    %c0 = arith.constant 0 : index
    %c0_0 = arith.constant 0 : index
    %0 = vector.load %arg2[%c0, %c0_0] : memref<30x6xf32, #tpu.memory_space<vmem>>, vector<30x6xf32>
    %c0_1 = arith.constant 0 : index
    %c0_2 = arith.constant 0 : index
    %1 = vector.load %arg1[%c0_1, %c0_2] : memref<6x128xf32, #tpu.memory_space<vmem>>, vector<6x128xf32>
    %cst = arith.constant dense<0.000000e+00> : vector<30x128xf32>
    %2 = tpu.matmul %0, %1, %cst {dimension_numbers = #tpu.dot_dimension_numbers<[1], [0], [0], [1], [0, 0, 1, 1], [], []>} : vector<30x6xf32>, vector<6x128xf32>, vector<30x128xf32> -> vector<30x128xf32>
    %c0_3 = arith.constant 0 : index
    %c0_4 = arith.constant 0 : index
    %3 = vector.load %arg3[%c0_3, %c0_4] : memref<30x1xf32, #tpu.memory_space<vmem>>, vector<30x1xf32>
    %4 = vector.broadcast %3 : vector<30x1xf32> to vector<30x128xf32>
    %5 = arith.addf %2, %4 : vector<30x128xf32>
    %cst_5 = arith.constant 0.000000e+00 : f32
    %6 = vector.broadcast %cst_5 : f32 to vector<30x128xf32>
    %7 = arith.maximumf %5, %6 : vector<30x128xf32>
    %c0_6 = arith.constant 0 : index
    %c0_7 = arith.constant 0 : index
    %8 = vector.load %arg4[%c0_6, %c0_7] : memref<30x1xf32, #tpu.memory_space<vmem>>, vector<30x1xf32>
    %9 = vector.broadcast %8 : vector<30x1xf32> to vector<30x128xf32>
    %10 = arith.mulf %7, %9 : vector<30x128xf32>
    %cst_8 = arith.constant dense<0.000000e+00> : vector<128xf32>
    %11 = vector.multi_reduction <add>, %10, %cst_8 [0] : vector<30x128xf32> to vector<128xf32>
    %12 = vector.shape_cast %11 : vector<128xf32> to vector<1x128xf32>
    %c0_9 = arith.constant 0 : index
    %c0_10 = arith.constant 0 : index
    %13 = vector.load %arg5[%c0_9, %c0_10] : memref<1x1xf32, #tpu.memory_space<vmem>>, vector<1x1xf32>
    %14 = vector.broadcast %13 : vector<1x1xf32> to vector<1x128xf32>
    %15 = arith.addf %12, %14 : vector<1x128xf32>
    %c0_11 = arith.constant 0 : index
    %c0_12 = arith.constant 0 : index
    %16 = vector.load %arg6[%c0_11, %c0_12] : memref<1x128xf32, #tpu.memory_space<vmem>>, vector<1x128xf32>
    tpu.vector_store %arg6[%c0_11, %c0_12], %15 {strides = array<i32>} : memref<1x128xf32, #tpu.memory_space<vmem>>, vector<1x128xf32>,
    return
  }
  func.func @transform_0(%arg0: i32) -> (i32, i32) {
    %c0_i32 = arith.constant 0 : i32
    %c0_i32_0 = arith.constant 0 : i32
    return %c0_i32, %arg0 : i32, i32
  }
  func.func @transform_1(%arg0: i32) -> (i32, i32) {
    %c0_i32 = arith.constant 0 : i32
    %c0_i32_0 = arith.constant 0 : i32
    %c0_i32_1 = arith.constant 0 : i32
    return %c0_i32, %c0_i32_0 : i32, i32
  }
  func.func @transform_2(%arg0: i32) -> (i32, i32) {
    %c0_i32 = arith.constant 0 : i32
    %c0_i32_0 = arith.constant 0 : i32
    %c0_i32_1 = arith.constant 0 : i32
    return %c0_i32, %c0_i32_0 : i32, i32
  }
  func.func @transform_3(%arg0: i32) -> (i32, i32) {
    %c0_i32 = arith.constant 0 : i32
    %c0_i32_0 = arith.constant 0 : i32
    %c0_i32_1 = arith.constant 0 : i32
    return %c0_i32, %c0_i32_0 : i32, i32
  }
  func.func @transform_4(%arg0: i32) -> (i32, i32) {
    %c0_i32 = arith.constant 0 : i32
    %c0_i32_0 = arith.constant 0 : i32
    %c0_i32_1 = arith.constant 0 : i32
    return %c0_i32, %c0_i32_0 : i32, i32
  }
  func.func @transform_5(%arg0: i32) -> (i32, i32) {
    %c0_i32 = arith.constant 0 : i32
    %c0_i32_0 = arith.constant 0 : i32
    return %c0_i32, %arg0 : i32, i32
  }
}

</mosaic_0001>

<bundles_post_ra>
// kernel: cnet_forward.1
= control target key start
LH: loop header
LB: loop body
LE: loop exit
PB: predicated region body
PF: predicated region fallthrough
CT: control target
= control target key end

     0   :  { %vm64_vm0 = vcmask 1045504   ;;  %vm51_vm1 = vcmask 48128   ;;  %v234_v3 = vmov 0   ;;  %v201_v43 = vlaneseq  ;;  %s319_s0 = inlined_call_operand.vmem [shape: f32[6,128], index: 0, kind: input, shape index: {}]   ;;  %s320_s1 = inlined_call_operand.vmem [shape: f32[30,6], index: 1, kind: input, shape index: {}]   ;;  %s321_s2 = inlined_call_operand.vmem [shape: f32[30,1], index: 2, kind: input, shape index: {}]   ;;  %s322_s4 = inlined_call_operand.<no memory space> [shape: f32[1,1], index: 4, kind: input, shape index: {}]   ;;  %s323_s3 = inlined_call_operand.vmem [shape: f32[30,1], index: 3, kind: input, shape index: {}]   ;;  %s324_s5 = inlined_call_operand.vmem [shape: f32[1,128], index: 5, kind: output, shape index: {}]  }
   0x1   :  { %v26_v0 = vld [vmem:[%s319_s0] sm:$0x3f]  ;;  %v24_v2 = vld [vmem:[%s320_s1 + $0x10] sm:$0xff]  ;;  %232 = vset.pattern.permute.xlu0 %v234_v3  ;;  %233 = vset.pattern.permute.xlu1 %v234_v3  ;;  %v10_v4 = vstv %s322_s4  ;;  %v23_v5 = vld [vmem:[%s320_s1 + $0x8] sm:$0xff] }
   0x2   :  { %v22_v1 = vld [vmem:[%s320_s1] sm:$0xff]  ;;  %221 = vmatprep.subr.msk.mxu0 %vm64_vm0, %v26_v0  ;;  %229 = vmatprep.subr.msk.mxu1 %vm64_vm0, %v26_v0  ;;  %v25_v6 = vld [vmem:[%s320_s1 + $0x18] sm:$0x3f]  ;;  %11 = vst [vmem:[#allocation2] sm:$0x1] %v10_v4  ;;  %v29_v8 = vld [vmem:[%s321_s2 + $0x10] sm:$0xff] }
   0x3   :  { %222 = vmatpush3.msk.msra.mxu0 %vm64_vm0, %v26_v0  ;;  %230 = vmatpush3.msk.msra.mxu1 %vm64_vm0, %v26_v0  ;;  %v27_v7 = vld [vmem:[%s321_s2] sm:$0xff]  ;;  %v28_v9 = vld [vmem:[%s321_s2 + $0x8] sm:$0xff]  ;;  %v30_v10 = vld [vmem:[%s321_s2 + $0x18] sm:$0x3f]  ;;  %v202_v46 = vshrl.u32 %v201_v43, 7 }
   0x4   :  { %223 = vmatprep.mubr.msk.f32.mxu0 %vm51_vm1, %v22_v1  ;;  %226 = vmatprep.mubr.msk.f32.mxu1 %vm51_vm1, %v24_v2  ;;  %v157_v11 = vld [vmem:[%s323_s3] sm:$0xff]  ;;  %v158_v12 = vld [vmem:[%s323_s3 + $0x8] sm:$0xff]  ;;  %v159_v13 = vld [vmem:[%s323_s3 + $0x10] sm:$0xff] }
   0x5   :  { %224 = vmatmul.mubr.msk.f32.vlgmr.msra.gmra.mrb[0].mxu0 %vm51_vm1, %v23_v5  ;;  %227 = vmatmul.mubr.msk.f32.vlgmr.msra.gmra.mrb[0].mxu1 %vm51_vm1, %v25_v6  ;;  %v160_v14 = vld [vmem:[%s323_s3 + $0x18] sm:$0x3f]  ;;  %v203_v49 = vsub.s32 0, %v202_v46 }
   0x6   :  { %33 = vperm.xlu0 %232, %v27_v7   ;;  %43 = vperm.xlu1 %233, %v29_v8  }
   0x9   :  { %v195_v15 = vld [vmem:[#allocation2] sm:$0x1] }
   0xa   :  { %38 = vperm.xlu0 %232, %v28_v9   ;;  %48 = vperm.xlu1 %233, %v30_v10  }
   0xe   :  { %163 = vperm.xlu0 %232, %v157_v11   ;;  %168 = vperm.xlu1 %233, %v158_v12  }
  0x12   :  { %173 = vperm.xlu0 %232, %v159_v13   ;;  %178 = vperm.xlu1 %233, %v160_v14  }
  0x16   :  { %198 = vperm.xlu0 %232, %v195_v15  }
  0x85   :  { %v34_v16 = vpop.permute.xlu0 %33  ;;  %v44_v17 = vpop.permute.xlu1 %43 }
  0x89   :  { %v39_v18 = vpop.permute.xlu0 %38  ;;  %v49_v19 = vpop.permute.xlu1 %48 }
  0x8d   :  { %v164_v20 = vpop.permute.xlu0 %163  ;;  %v169_v21 = vpop.permute.xlu1 %168 }
  0x91   :  { %v179_v35 = vpop.permute.xlu1 %178  ;;  %v174_v37 = vpop.permute.xlu0 %173 }
  0x95   :  { %v199_v51 = vpop.permute.xlu0 %198 }
  0x96   :  { %v204_v53 = vrot.slane %v199_v51, %v203_v49 }
  0xd8   :  { %v225_v22 = vpop.f32.mrb[0].mxu0  ;;  %v228_v23 = vpop.f32.mrb[0].mxu1 }
  0xd9   :  { %v140_v24 = vadd.f32 %v225_v22, %v39_v18  ;;  %v150_v25 = vadd.f32 %v228_v23, %v49_v19  ;;  %v134_v26 = vpop.f32.mrb[1].mxu0  ;;  %v144_v27 = vpop.f32.mrb[1].mxu1 }
  0xda   :  { %v135_v28 = vadd.f32 %v134_v26, %v34_v16  ;;  %v145_v29 = vadd.f32 %v144_v27, %v44_v17 }
  0xdb   :  { %v154_v30 = vmax.f32 %v140_v24, 0.0  ;;  %v156_v31 = vmax.f32 %v150_v25, 0.0 }
  0xdc   :  { %v153_v32 = vmax.f32 %v135_v28, 0.0  ;;  %v155_v33 = vmax.f32 %v145_v29, 0.0 }
  0xdd   :  { %v182_v34 = vmul.f32 %v169_v21, %v154_v30  ;;  %v184_v38 = vmul.f32 %v179_v35, %v156_v31 }
  0xde   :  { %v181_v36 = vmul.f32 %v164_v20, %v153_v32  ;;  %v183_v40 = vmul.f32 %v174_v37, %v155_v33 }
  0xdf   :  { %v187_v42 = vsel %vm64_vm0, %v184_v38, 0.0 }
  0xe0   :  { %v185_v39 = vadd.f32 %v182_v34, %v181_v36 }
  0xe2   :  { %v186_v41 = vadd.f32 %v185_v39, %v183_v40 }
  0xe4   :  { %v188_v44 = vadd.f32 %v187_v42, %v186_v41 }
  0xe6   :  { %v189_v45 = vrot.slane %v188_v44, 4 }
  0xe8   :  { %v190_v47 = vadd.f32 %v189_v45, %v188_v44 }
  0xea   :  { %v191_v48 = vrot.slane %v190_v47, 2 }
  0xec   :  { %v192_v50 = vadd.f32 %v191_v48, %v190_v47 }
  0xee   :  { %v193_v52 = vrot.slane %v192_v50, 1 }
  0xf0   :  { %v194_v54 = vadd.f32 %v193_v52, %v192_v50 }
  0xf2   :  { %v205_v55 = vadd.f32 %v204_v53, %v194_v54 }
  0xf4   :  { %206 = vst [vmem:[%s324_s5] sm:$0x1] %v205_v55 }

</bundles_post_ra>
